<compile_context>
chip_gen: v7x
topology: tpu7x:2x2x1
jax: 0.10.0
libtpu: 0.0.40
codegen_flags: <defaults>
</compile_context>

<pallas_src>
import jax
import jax.numpy as jnp
from jax.experimental import pallas as pl
from jax.experimental.pallas import tpu as pltpu


_NEG_BIG = -1e30   # Python float (NOT a jnp scalar) so kernels never capture a constant


def _round_up(x, m):
    return ((x + m - 1) // m) * m


# ---------------------------------------------------------------------------
# 1. Per-sequence precompute: encoder-side attention projections (bf16 out).
# ---------------------------------------------------------------------------
def _proj_kernel(enc_ref, a1w_ref, a2w_ref, p1_ref, p2_ref):
    enc = enc_ref[...]                                               # bf16 (rt, He)
    p1_ref[...] = jnp.dot(enc, a1w_ref[...],
                          preferred_element_type=jnp.float32).astype(jnp.bfloat16)
    p2_ref[...] = jnp.dot(enc, a2w_ref[...],
                          preferred_element_type=jnp.float32).astype(jnp.bfloat16)


def precompute_encoder(enc_output, pad_mask, prep):
    """Run once per source sequence; reuse the result for every decode step."""
    B, S, He = enc_output.shape
    Hd = prep['Hd']
    BS = B * S
    enc_bf = enc_output.astype(jnp.bfloat16)
    enc2d = enc_bf.reshape(BS, He)
    rt = BS if BS <= 1024 else 512                    # row tile (v7x 64 MiB VMEM safe)
    nR = pl.cdiv(BS, rt)
    p1, p2 = pl.pallas_call(
        _proj_kernel,
        out_shape=(jax.ShapeDtypeStruct((BS, Hd), jnp.bfloat16),
                   jax.ShapeDtypeStruct((BS, Hd), jnp.bfloat16)),
        grid=(nR,),
        in_specs=[pl.BlockSpec((rt, He), lambda i: (i, 0)),
                  pl.BlockSpec((He, Hd), lambda i: (0, 0)),
                  pl.BlockSpec((He, Hd), lambda i: (0, 0))],
        out_specs=(pl.BlockSpec((rt, Hd), lambda i: (i, 0)),
                   pl.BlockSpec((rt, Hd), lambda i: (i, 0))),
        compiler_params=pltpu.CompilerParams(dimension_semantics=("parallel",)),
    )(enc2d, prep['a1wT'], prep['a2wT'])
    return dict(
        enc=enc_bf,                                             # bf16, halves per-step DMA
        proj1=p1.reshape(B, S, Hd),
        proj2=p2.reshape(B, S, Hd),
        mask_bias=pad_mask.astype(jnp.float32) * _NEG_BIG,      # additive mask bias
    )


# ---------------------------------------------------------------------------
# 2. Per-step state kernel: attention 1 / GRUCell / attention 2 / p_gen.
# ---------------------------------------------------------------------------
def _state_kernel(emb_ref, enc_ref, p1_ref, p2_ref, mb_ref, h_ref,
                  w_rzn_ref, w_nh_ref, b_ref, p_w_ref, p_b_ref,
                  hnew_ref, xcat_ref, pgen_ref, copyw_ref):
    f32 = jnp.float32
    emb = emb_ref[...]                               # (B, E)
    enc = enc_ref[...].astype(f32)                   # (B, S, He)
    mb = mb_ref[...]                                 # (B, S) additive mask bias
    h = h_ref[...]                                   # (B, Hd)

    def attn(hidden, proj_bf):
        scores = jnp.sum(hidden[:, None, :] * proj_bf.astype(f32), axis=2) + mb
        m = jnp.max(scores, axis=1, keepdims=True)
        e = jnp.exp(scores - m)
        return e * pl.reciprocal(jnp.sum(e, axis=1, keepdims=True), approx=False)

    # --- attention 1 + context 1 ---
    a1 = attn(h, p1_ref[...])
    ctx1 = jnp.sum(a1[:, :, None] * enc, axis=1)                         # (B, He)

    # --- GRUCell (PyTorch gate order r, z, n); deep concatenated-K matmuls ---
    xh = jnp.concatenate([emb, ctx1, h], axis=1)                         # (B, E+He+Hd)
    r = jax.nn.sigmoid(jnp.dot(xh, w_rzn_ref[0], preferred_element_type=f32)
                       + b_ref[0:1, :])
    z = jax.nn.sigmoid(jnp.dot(xh, w_rzn_ref[1], preferred_element_type=f32)
                       + b_ref[1:2, :])
    n = jnp.tanh(jnp.dot(xh, w_rzn_ref[2], preferred_element_type=f32) + b_ref[2:3, :]
                 + r * (jnp.dot(h, w_nh_ref[...], preferred_element_type=f32)
                        + b_ref[3:4, :]))
    h_new = (1.0 - z) * n + z * h
    hnew_ref[...] = h_new

    # --- attention 2 + context 2 ---
    a2 = attn(h_new, p2_ref[...])
    ctx2 = jnp.sum(a2[:, :, None] * enc, axis=1)                         # (B, He)

    # --- pre-concatenated operand for the vocab pass + generation gate ---
    xcat = jnp.concatenate([h_new, ctx2], axis=1)                        # (B, Hd+He)
    xcat_ref[...] = xcat.astype(jnp.bfloat16)

    p_gen = jax.nn.sigmoid(jnp.sum(xcat * p_w_ref[...], axis=1, keepdims=True)
                           + p_b_ref[...])
    pgen_ref[...] = p_gen
    copyw_ref[...] = (1.0 - p_gen) * a2


# ---------------------------------------------------------------------------
# 3. Fused vocab kernel: (phase 0) logits + online softmax, (phase 1) normalize,
#    gate by p_gen, add pointer/copy distribution.  Logits live only in VMEM.
# ---------------------------------------------------------------------------
def _vocab_kernel(tmin_ref, tmax_ref,                       # scalar-prefetch (SMEM)
                  xcat_ref, ow_ref, ob_ref, pgen_ref, copyw_ref, srcv_ref,
                  pout_ref, logits_sc, m_sc, l_sc):
    ph = pl.program_id(0)
    v = pl.program_id(1)
    B, TV = pout_ref.shape
    S = srcv_ref.shape[1]

    @pl.when(ph == 0)
    def _phase0():
        @pl.when(v == 0)
        def _():
            m_sc[...] = jnp.full(m_sc.shape, _NEG_BIG, m_sc.dtype)
            l_sc[...] = jnp.zeros_like(l_sc)
        logits = (jnp.dot(xcat_ref[...], ow_ref[...],
                          preferred_element_type=jnp.float32) + ob_ref[...])
        logits_sc[v] = logits
        m_old = m_sc[...]
        m_new = jnp.maximum(m_old, jnp.max(logits, axis=1, keepdims=True))
        l_sc[...] = (l_sc[...] * jnp.exp(m_old - m_new)
                     + jnp.sum(jnp.exp(logits - m_new), axis=1, keepdims=True))
        m_sc[...] = m_new

    @pl.when(ph == 1)
    def _phase1():
        inv_l = pl.reciprocal(l_sc[...], approx=False)      # exact final normalization
        logits = logits_sc[v]
        pout_ref[...] = jnp.exp(logits - m_sc[...]) * inv_l * pgen_ref[...]

        # scatter_add_(1, src, (1 - p_gen) * a2), restricted to this vocab tile.
        col = jax.lax.broadcasted_iota(jnp.int32, (B, TV), 1) + v * TV
        src = srcv_ref[...]
        cw = copyw_ref[...]
        # TODO(synk): for very long source sequences replace the static unroll with a
        # fori_loop over per-(b,s) SMEM-gated scalar updates.
        for s in range(S):
            @pl.when((v >= tmin_ref[s]) & (v <= tmax_ref[s]))
            def _(s=s):
                pout_ref[...] = pout_ref[...] + jnp.where(
                    col == src[:, s:s + 1], cw[:, s:s + 1], 0.0)


# ---------------------------------------------------------------------------
# Parameter preparation (once per model): split / transposed / padded weights.
# ---------------------------------------------------------------------------
def prepare_params(params, emb_dim, enc_hid_dim, dec_hid_dim, vocab_size, max_n_oov):
    E, He, Hd, V = emb_dim, enc_hid_dim, dec_hid_dim, vocab_size
    V_ext = V + max_n_oov
    v_tile = min(2048, _round_up(V_ext, 128))
    V_pad = _round_up(V_ext, v_tile)
    K2 = Hd + He

    w_ih, w_hh = params['w_ih'], params['w_hh']       # (3*Hd, E+He), (3*Hd, Hd)
    b_ih, b_hh = params['b_ih'], params['b_hh']
    w_ir, w_iz, w_in = w_ih[:Hd], w_ih[Hd:2 * Hd], w_ih[2 * Hd:]
    w_hr, w_hz, w_hn = w_hh[:Hd], w_hh[Hd:2 * Hd], w_hh[2 * Hd:]

    # Concatenated-K gate weights over xh = [emb | ctx1 | h]; the n-gate's hidden block is
    # zeroed because its hidden contribution is r-gated (handled via w_nh separately).
    w_r = jnp.concatenate([w_ir.T, w_hr.T], axis=0)                     # (E+He+Hd, Hd)
    w_z = jnp.concatenate([w_iz.T, w_hz.T], axis=0)
    w_nx = jnp.concatenate([w_in.T, jnp.zeros((Hd, Hd), jnp.float32)], axis=0)
    w_rzn = jnp.stack([w_r, w_z, w_nx], axis=0).astype(jnp.float32)     # (3, E+He+Hd, Hd)

    b_gru = jnp.stack([b_ih[:Hd] + b_hh[:Hd],
                       b_ih[Hd:2 * Hd] + b_hh[Hd:2 * Hd],
                       b_ih[2 * Hd:], b_hh[2 * Hd:]], axis=0)           # (4, Hd)

    # Single concatenated output projection over xcat = [h_new | ctx2], padded to V_pad
    # lanes; bias -1e30 past V removes generation mass from OOV / pad columns.
    out_w, out_b = params['out_w'], params['out_b']    # (V, Hd+He), (V,)
    W_out = jnp.zeros((K2, V_pad), jnp.float32).at[:, :V].set(out_w.T)
    out_bias = jnp.full((1, V_pad), _NEG_BIG, jnp.float32).at[:, :V].set(
        out_b.reshape(1, V))

    return dict(
        E=E, He=He, Hd=Hd, V=V, V_ext=V_ext, V_pad=V_pad, v_tile=v_tile, K=K2,
        a1wT=params['attn1_w'].T.astype(jnp.bfloat16),      # (He, Hd)
        a2wT=params['attn2_w'].T.astype(jnp.bfloat16),
        w_rzn=w_rzn, w_nh=w_hn.T.astype(jnp.float32), b_gru=b_gru,
        p_w=params['p_w'].astype(jnp.float32),              # (1, Hd+He), order [h | ctx2]
        p_b=params['p_b'].reshape(1, 1),
        out_w=W_out.astype(jnp.bfloat16),                   # (Hd+He, V_pad), streamed
        out_b=out_bias,                                     # (1, V_pad) f32
    )


# ---------------------------------------------------------------------------
# One decode step (matches PyTorch Decoder.forward semantics).
# ---------------------------------------------------------------------------
def decoder_step(embedded, h1, src_ext, enc_pre, prep):
    B = embedded.shape[0]
    S = enc_pre['mask_bias'].shape[1]
    Hd, He, K = prep['Hd'], prep['He'], prep['K']
    V_pad, TV, V_ext = prep['V_pad'], prep['v_tile'], prep['V_ext']
    nV = V_pad // TV
    vmem = pl.BlockSpec(memory_space=pltpu.MemorySpace.VMEM)

    # --- state kernel: GRU + both attentions + p_gen ---
    state_inputs = (
        embedded.astype(jnp.float32), enc_pre['enc'],
        enc_pre['proj1'], enc_pre['proj2'], enc_pre['mask_bias'],
        h1.astype(jnp.float32),
        prep['w_rzn'], prep['w_nh'], prep['b_gru'], prep['p_w'], prep['p_b'],
    )
    h_new, xcat, p_gen, copy_w = pl.pallas_call(
        _state_kernel,
        out_shape=(jax.ShapeDtypeStruct((B, Hd), jnp.float32),
                   jax.ShapeDtypeStruct((B, K), jnp.bfloat16),
                   jax.ShapeDtypeStruct((B, 1), jnp.float32),
                   jax.ShapeDtypeStruct((B, S), jnp.float32)),
        in_specs=[vmem] * len(state_inputs),
        out_specs=(vmem, vmem, vmem, vmem),
    )(*state_inputs)

    # Tile-membership bounds per source position (tiny XLA ops), prefetched to SMEM.
    src = src_ext.astype(jnp.int32)
    tile_id = src // TV
    tmin = jnp.min(tile_id, axis=0).astype(jnp.int32)      # (S,)
    tmax = jnp.max(tile_id, axis=0).astype(jnp.int32)      # (S,)

    est_vmem = (nV * B * TV * 4 + 3 * (K * TV * 2 + 4 * TV + B * TV * 4)
                + 2 * (1 << 20))
    vmem_limit = int(min(112 * (1 << 20), max(32 * (1 << 20), est_vmem)))

    # --- fused vocab kernel: phase 0 = logits/online-softmax, phase 1 = normalize+copy ---
    grid_spec = pltpu.PrefetchScalarGridSpec(
        num_scalar_prefetch=2,
        grid=(2, nV),
        in_specs=[
            pl.BlockSpec((B, K), lambda ph, v, *_: (0, 0)),             # xcat bf16
            pl.BlockSpec((K, TV), lambda ph, v, *_: (0, v * (1 - ph))),  # out_w (stream ph0)
            pl.BlockSpec((1, TV), lambda ph, v, *_: (0, v * (1 - ph))),  # out_b
            pl.BlockSpec((B, 1), lambda ph, v, *_: (0, 0)),             # p_gen
            pl.BlockSpec((B, S), lambda ph, v, *_: (0, 0)),             # copy_w
            pl.BlockSpec((B, S), lambda ph, v, *_: (0, 0)),             # src int32
        ],
        out_specs=pl.BlockSpec((B, TV), lambda ph, v, *_: (0, v * ph)),
        scratch_shapes=[pltpu.VMEM((nV, B, TV), jnp.float32),   # resident logits
                        pltpu.VMEM((B, 1), jnp.float32),        # m
                        pltpu.VMEM((B, 1), jnp.float32)],       # l
    )
    p_out_pad = pl.pallas_call(
        _vocab_kernel,
        out_shape=jax.ShapeDtypeStruct((B, V_pad), jnp.float32),
        grid_spec=grid_spec,
        compiler_params=pltpu.CompilerParams(
            dimension_semantics=("arbitrary", "arbitrary"),
            vmem_limit_bytes=vmem_limit),
    )(tmin, tmax, xcat, prep['out_w'], prep['out_b'], p_gen, copy_w, src)

    return p_out_pad[:, :V_ext], h_new


def decoder_forward(embedded, enc_output, h1, pad_mask, max_n_oov,
                    source_word_encoding_extended, params):
    """Drop-in equivalent of Decoder.forward(...) -> (p_out, h1)."""
    _, _, He = enc_output.shape
    E = embedded.shape[1]
    Hd = h1.shape[1]
    V = params['out_w'].shape[0]
    prep = prepare_params(params, E, He, Hd, V, max_n_oov)
    enc_pre = precompute_encoder(enc_output, pad_mask, prep)
    return decoder_step(embedded, h1, source_word_encoding_extended, enc_pre, prep)


if __name__ == "__main__":
    key = jax.random.PRNGKey(0)
    B, S = 4, 8
    emb_dim, enc_hid, dec_hid = 16, 32, 32
    vocab, max_n_oov = 64, 8

    ks = jax.random.split(key, 16)

    def init(k, shape, scale=0.1):
        return jax.random.normal(k, shape, dtype=jnp.float32) * scale

    params = dict(
        attn1_w=init(ks[0], (dec_hid, enc_hid)),                 # Attention.attn (no bias)
        attn2_w=init(ks[1], (dec_hid, enc_hid)),                 # Attention2.attn (no bias)
        w_ih=init(ks[2], (3 * dec_hid, emb_dim + enc_hid)),      # GRUCell weight_ih (r,z,n)
        w_hh=init(ks[3], (3 * dec_hid, dec_hid)),                # GRUCell weight_hh
        b_ih=init(ks[4], (3 * dec_hid,)),
        b_hh=init(ks[5], (3 * dec_hid,)),
        out_w=init(ks[6], (vocab, enc_hid + dec_hid)),           # self.out
        out_b=init(ks[7], (vocab,)),
        p_w=init(ks[8], (1, enc_hid + dec_hid)),                 # self.p
        p_b=init(ks[9], (1,)),
    )

    embedded = init(ks[10], (B, emb_dim), 1.0)
    enc_output = init(ks[11], (B, S, enc_hid), 1.0)
    h1 = init(ks[12], (B, dec_hid), 1.0)
    pad_mask = jnp.zeros((B, S), dtype=jnp.bool_).at[:, S - 2:].set(True)
    source_ext = jax.random.randint(ks[13], (B, S), 0, vocab + max_n_oov,
                                    dtype=jnp.int32)

    p_out, h_new = decoder_forward(embedded, enc_output, h1, pad_mask,
                                   max_n_oov, source_ext, params)
    jax.block_until_ready((p_out, h_new))

    assert p_out.shape == (B, vocab + max_n_oov) and h_new.shape == (B, dec_hid)
    assert bool(jnp.all(jnp.isfinite(p_out))) and bool(jnp.all(jnp.isfinite(h_new)))
    # rows of p_out should sum to ~1: p_gen * softmax + (1 - p_gen) * attention weights
    row_sums = jnp.sum(p_out, axis=1)
    assert bool(jnp.all(jnp.abs(row_sums - 1.0) < 5e-2)), row_sums
    print("KERNEL_OK")
</pallas_src>

<mosaic_0001>
module attributes {stable_mosaic.version = 11 : i64} {
  func.func @_proj_kernel(%arg0: i32, %arg1: memref<32x32xbf16, #tpu.memory_space<vmem>>, %arg2: memref<32x32xbf16, #tpu.memory_space<vmem>>, %arg3: memref<32x32xbf16, #tpu.memory_space<vmem>>, %arg4: memref<32x32xbf16, #tpu.memory_space<vmem>>, %arg5: memref<32x32xbf16, #tpu.memory_space<vmem>>) attributes {dimension_semantics = [#tpu.dimension_semantics<parallel>], iteration_bounds = array<i64: 1>, scalar_prefetch = 0 : i64, scratch_operands = 0 : i64, tpu.core_type = #tpu.core_type<tc>, window_params = [{transform_indices = @transform_0, window_bounds = array<i64: 32, 32>}, {pipeline_mode = #tpu.pipeline_mode<synchronous>, transform_indices = @transform_1, window_bounds = array<i64: 32, 32>}, {pipeline_mode = #tpu.pipeline_mode<synchronous>, transform_indices = @transform_2, window_bounds = array<i64: 32, 32>}, {transform_indices = @transform_3, window_bounds = array<i64: 32, 32>}, {transform_indices = @transform_4, window_bounds = array<i64: 32, 32>}]} {
    %c0 = arith.constant 0 : index
    %c0_0 = arith.constant 0 : index
    %0 = vector.load %arg1[%c0, %c0_0] : memref<32x32xbf16, #tpu.memory_space<vmem>>, vector<32x32xbf16>
    %c0_1 = arith.constant 0 : index
    %c0_2 = arith.constant 0 : index
    %1 = vector.load %arg2[%c0_1, %c0_2] : memref<32x32xbf16, #tpu.memory_space<vmem>>, vector<32x32xbf16>
    %cst = arith.constant dense<0.000000e+00> : vector<32x32xf32>
    %2 = tpu.matmul %0, %1, %cst {dimension_numbers = #tpu.dot_dimension_numbers<[1], [0], [0], [1], [0, 0, 1, 1], [], []>} : vector<32x32xbf16>, vector<32x32xbf16>, vector<32x32xf32> -> vector<32x32xf32>
    %3 = arith.truncf %2 : vector<32x32xf32> to vector<32x32xbf16>
    %c0_3 = arith.constant 0 : index
    %c0_4 = arith.constant 0 : index
    %4 = vector.load %arg4[%c0_3, %c0_4] : memref<32x32xbf16, #tpu.memory_space<vmem>>, vector<32x32xbf16>
    tpu.vector_store %arg4[%c0_3, %c0_4], %3 {strides = array<i32>} : memref<32x32xbf16, #tpu.memory_space<vmem>>, vector<32x32xbf16>,
    %c0_5 = arith.constant 0 : index
    %c0_6 = arith.constant 0 : index
    %5 = vector.load %arg3[%c0_5, %c0_6] : memref<32x32xbf16, #tpu.memory_space<vmem>>, vector<32x32xbf16>
    %cst_7 = arith.constant dense<0.000000e+00> : vector<32x32xf32>
    %6 = tpu.matmul %0, %5, %cst_7 {dimension_numbers = #tpu.dot_dimension_numbers<[1], [0], [0], [1], [0, 0, 1, 1], [], []>} : vector<32x32xbf16>, vector<32x32xbf16>, vector<32x32xf32> -> vector<32x32xf32>
    %7 = arith.truncf %6 : vector<32x32xf32> to vector<32x32xbf16>
    %c0_8 = arith.constant 0 : index
    %c0_9 = arith.constant 0 : index
    %8 = vector.load %arg5[%c0_8, %c0_9] : memref<32x32xbf16, #tpu.memory_space<vmem>>, vector<32x32xbf16>
    tpu.vector_store %arg5[%c0_8, %c0_9], %7 {strides = array<i32>} : memref<32x32xbf16, #tpu.memory_space<vmem>>, vector<32x32xbf16>,
    return
  }
  func.func @transform_0(%arg0: i32) -> (i32, i32) {
    %c0_i32 = arith.constant 0 : i32
    %c0_i32_0 = arith.constant 0 : i32
    return %arg0, %c0_i32 : i32, i32
  }
  func.func @transform_1(%arg0: i32) -> (i32, i32) {
    %c0_i32 = arith.constant 0 : i32
    %c0_i32_0 = arith.constant 0 : i32
    %c0_i32_1 = arith.constant 0 : i32
    return %c0_i32, %c0_i32_0 : i32, i32
  }
  func.func @transform_2(%arg0: i32) -> (i32, i32) {
    %c0_i32 = arith.constant 0 : i32
    %c0_i32_0 = arith.constant 0 : i32
    %c0_i32_1 = arith.constant 0 : i32
    return %c0_i32, %c0_i32_0 : i32, i32
  }
  func.func @transform_3(%arg0: i32) -> (i32, i32) {
    %c0_i32 = arith.constant 0 : i32
    %c0_i32_0 = arith.constant 0 : i32
    return %arg0, %c0_i32 : i32, i32
  }
  func.func @transform_4(%arg0: i32) -> (i32, i32) {
    %c0_i32 = arith.constant 0 : i32
    %c0_i32_0 = arith.constant 0 : i32
    return %arg0, %c0_i32 : i32, i32
  }
}

</mosaic_0001>

<bundles_post_ra>
// kernel: tpu_custom_call.1
= control target key start
LH: loop header
LB: loop body
LE: loop exit
PB: predicated region body
PF: predicated region fallthrough
CT: control target
= control target key end

     0   :  { %10 = vsyncpa [#allocation3], 0  ;;  %s596_s0 = inlined_call_operand.hbm [shape: bf16[32,32], index: 0, kind: input, shape index: {}]   ;;  %s597_s1 = inlined_call_operand.hbm [shape: bf16[32,32], index: 1, kind: input, shape index: {}]   ;;  %s598_s2 = inlined_call_operand.hbm [shape: bf16[32,32], index: 2, kind: input, shape index: {}]   ;;  %s599_s3 = inlined_call_operand.hbm [shape: bf16[32,32], index: 3, kind: output, shape index: {0}]   ;;  %s600_s4 = inlined_call_operand.hbm [shape: bf16[32,32], index: 4, kind: output, shape index: {1}]  }
   0x1   :  { %11 = vsyncpa [#allocation6], 0 }
   0x2   :  { %12 = vsyncpa [#allocation4], 0 }
   0x3   :  { %13 = vsyncpa [#allocation10], 0  ;;  %s467_s15 = smov [#allocation5]   ;;  %s468_s17 = smov [#allocation2]  }
   0x4   :  { %s31_s16 = sshll.u32 %s467_s15, 4  ;;  %s19_s18 = sshll.u32 %s468_s17, 4  ;;  %s32_s16 = int_to_ptr.vmem [resolvable:$true] %s31_s16  ;;  %s499_s18 = int_to_ptr.vmem [resolvable:$true] %s19_s18 }
   0x5   :  { %s349_s21 = scalar_lea.hbm %s597_s1, 256 }
   0x6   :  { %p350_p0 = scmp.ne.s32.totalorder %s597_s1, %s349_s21  ;;  %p353_p1 = scmp.lt.u32.totalorder %s349_s21, %s597_s1 }
   0x8   :  { %p355_p2 = pnand %p353_p1, %p350_p0 }
   0xa   :  { %358 = shalt.err (!%p355_p2)
}
   0xb   :  { %s359_s26 = scalar_lea.vmem %s32_s16, 256  ;;  %p364_p4 = scmp.lt.s32.totalorder %s32_s16, %s32_s16 }
   0xc   :  { %p360_p3 = scmp.ne.s32.totalorder %s32_s16, %s359_s26  ;;  %p365_p5 = scmp.lt.s32.totalorder %s359_s26, %s359_s26 }
   0xe   :  { %p366_p6 = por %p365_p5, %p364_p4 }
  0x10   :  { %p367_p7 = pnand %p366_p6, %p360_p3 }
  0x12   :  { %370 = shalt.err (!%p367_p7)
}
  0x13   :  { %s469_s27 = smov 64   ;;  %s470_s28 = smov 4  }
  0x14   :  { %37 = dma.hbm_to_vmem [thread:$0]  %s597_s1, 256, %s32_s16, [#allocation6], %s469_s27, %s469_s27, %s470_s28  }
  0x15   :  { %s371_s7 = scalar_lea.hbm %s596_s0, 256 }
  0x16   :  { %p372_p8 = scmp.ne.s32.totalorder %s596_s0, %s371_s7  ;;  %p375_p9 = scmp.lt.u32.totalorder %s371_s7, %s596_s0 }
  0x18   :  { %p377_p10 = pnand %p375_p9, %p372_p8 }
  0x1a   :  { %380 = shalt.err (!%p377_p10)
}
  0x1b   :  { %s381_s12 = scalar_lea.vmem %s499_s18, 256  ;;  %p386_p12 = scmp.lt.s32.totalorder %s499_s18, %s499_s18 }
  0x1c   :  { %p382_p11 = scmp.ne.s32.totalorder %s499_s18, %s381_s12  ;;  %p387_p13 = scmp.lt.s32.totalorder %s381_s12, %s381_s12 }
  0x1e   :  { %p388_p0 = por %p387_p13, %p386_p12 }
  0x20   :  { %p389_p1 = pnand %p388_p0, %p382_p11 }
  0x22   :  { %392 = shalt.err (!%p389_p1)
}
  0x23   :  { %25 = dma.hbm_to_vmem [thread:$0]  %s596_s0, 256, %s499_s18, [#allocation3], %s469_s27, %s469_s27, %s470_s28  }
  0x24   :  { %s471_s14 = smov [#allocation7]   ;;  %s393_s19 = scalar_lea.hbm %s598_s2, 256 }
  0x25   :  { %s43_s15 = sshll.u32 %s471_s14, 4  ;;  %p394_p2 = scmp.ne.s32.totalorder %s598_s2, %s393_s19  ;;  %s44_s15 = int_to_ptr.vmem [resolvable:$true] %s43_s15 }
  0x26   :  { %p397_p3 = scmp.lt.u32.totalorder %s393_s19, %s598_s2 }
  0x28   :  { %p399_p4 = pnand %p397_p3, %p394_p2 }
  0x2a   :  { %402 = shalt.err (!%p399_p4)
}
  0x2b   :  { %s403_s24 = scalar_lea.vmem %s44_s15, 256  ;;  %p408_p6 = scmp.lt.s32.totalorder %s44_s15, %s44_s15 }
  0x2c   :  { %p404_p5 = scmp.ne.s32.totalorder %s44_s15, %s403_s24  ;;  %p409_p7 = scmp.lt.s32.totalorder %s403_s24, %s403_s24 }
  0x2e   :  { %p410_p8 = por %p409_p7, %p408_p6 }
  0x30   :  { %p411_p9 = pnand %p410_p8, %p404_p5 }
  0x32   :  { %414 = shalt.err (!%p411_p9)
}
  0x33   :  { %49 = dma.hbm_to_vmem [thread:$0]  %s598_s2, 256, %s44_s15, [#allocation6], %s469_s27, %s469_s27, %s470_s28  }
  0x34   :  { %459 = dma.done.wait [#allocation3], 256  }
  0x35   :  { %460 = vsyncadd [#allocation3], 4294967040 }
  0x36   :  { %461 = dma.done.wait [#allocation6], 512  }
  0x37   :  { %462 = vsyncadd [#allocation6], 4294966784  ;;  %v343_v0 = vld [vmem:[#allocation5] sm:$0xff]   ;;  %v344_v1 = vld [vmem:[#allocation7] sm:$0xff]   ;;  %vm90_vm0 = vcmask 261120   ;;  %vm162_vm1 = vcmask 257024  }
  0x38   :  { %320 = vmatprep.subr.bf16.mxu0 %v343_v0  ;;  %v345_v2 = vld [vmem:[#allocation5 + $0x8] sm:$0xff]   ;;  %328 = vmatprep.subr.bf16.mxu1 %v344_v1  ;;  %v346_v3 = vld [vmem:[#allocation7 + $0x8] sm:$0xff]   ;;  %v347_v4 = vld [vmem:[#allocation2] sm:$0xff]   ;;  %s472_s2 = smov [#allocation8]   ;;  %s473_s26 = smov [#allocation9]  }
  0x39   :  { %321 = vmatpush3.bf16.msra.mxu0 %v343_v0  ;;  %329 = vmatpush3.bf16.msra.mxu1 %v344_v1  ;;  %v348_v5 = vld [vmem:[#allocation2 + $0x8] sm:$0xff]   ;;  %s257_s25 = sshll.u32 %s472_s2, 4  ;;  %s269_s29 = sshll.u32 %s473_s26, 4  ;;  %s258_s25 = int_to_ptr.vmem [resolvable:$true] %s257_s25  ;;  %s556_s29 = int_to_ptr.vmem [resolvable:$true] %s269_s29 }
  0x3a   :  { %322 = vmatprep.subr.bf16.mxu0 %v345_v2  ;;  %330 = vmatprep.subr.bf16.mxu1 %v346_v3  ;;  %s415_s30 = scalar_lea.vmem %s258_s25, 256  ;;  %p420_p11 = scmp.lt.s32.totalorder %s258_s25, %s258_s25 }
  0x3b   :  { %324 = vmatprep.mubr.msk.bf16.mxu0 %vm90_vm0, %v347_v4  ;;  %332 = vmatprep.mubr.msk.bf16.mxu1 %vm90_vm0, %v347_v4  ;;  %p416_p10 = scmp.ne.s32.totalorder %s258_s25, %s415_s30  ;;  %p421_p12 = scmp.lt.s32.totalorder %s415_s30, %s415_s30 }
  0x3d   :  { %323 = vmatpush3.bf16.msra.mxu0 %v345_v2  ;;  %331 = vmatpush3.bf16.msra.mxu1 %v346_v3  ;;  %p422_p13 = por %p421_p12, %p420_p11 }
  0x3f   :  { %p423_p0 = pnand %p422_p13, %p416_p10 }
  0x40   :  { %325 = vmatmul.mubr.msk.bf16.vlgmr.msra.gmra.mrb[0].mxu0 %vm90_vm0, %v348_v5  ;;  %333 = vmatmul.mubr.msk.bf16.vlgmr.msra.gmra.mrb[0].mxu1 %vm90_vm0, %v348_v5 }
 0x113   :  { %v326_v6 = vpop.f32.mrb[0].mxu0  ;;  %v334_v8 = vpop.f32.mrb[0].mxu1 }
 0x114   :  { %v306_v7 = vpack.c.bf16 %v326_v6, %v326_v6  ;;  %v131_v9 = vpop.f32.mrb[1].mxu0  ;;  %v310_v10 = vpack.c.bf16 %v334_v8, %v334_v8  ;;  %v217_v12 = vpop.f32.mrb[1].mxu1 }
 0x115   :  { %v304_v11 = vpack.c.bf16 %v131_v9, %v131_v9  ;;  %v327_v13 = vpop.f32.mrb[2].mxu0  ;;  %v308_v14 = vpack.c.bf16 %v217_v12, %v217_v12  ;;  %v335_v16 = vpop.f32.mrb[2].mxu1 }
 0x116   :  { %165 = vst.msk [vmem:[#allocation8 + $0x8] sm:$0xf] %vm162_vm1, %v306_v7  ;;  %v307_v15 = vpack.c.bf16 %v327_v13, %v327_v13  ;;  %v134_v17 = vpop.f32.mrb[3].mxu0  ;;  %250 = vst.msk [vmem:[#allocation9 + $0x8] sm:$0xf] %vm162_vm1, %v310_v10  ;;  %v311_v18 = vpack.c.bf16 %v335_v16, %v335_v16  ;;  %v220_v20 = vpop.f32.mrb[3].mxu1 }
 0x117   :  { %163 = vst.msk [vmem:[#allocation8] sm:$0xf] %vm162_vm1, %v304_v11  ;;  %v305_v19 = vpack.c.bf16 %v134_v17, %v134_v17  ;;  %248 = vst.msk [vmem:[#allocation9] sm:$0xf] %vm162_vm1, %v308_v14  ;;  %v309_v21 = vpack.c.bf16 %v220_v20, %v220_v20 }
 0x118   :  { %166 = vst.msk [vmem:[#allocation8 + $0xc] sm:$0xf] %vm162_vm1, %v307_v15  ;;  %251 = vst.msk [vmem:[#allocation9 + $0xc] sm:$0xf] %vm162_vm1, %v311_v18 }
 0x119   :  { %164 = vst.msk [vmem:[#allocation8 + $0x4] sm:$0xf] %vm162_vm1, %v305_v19  ;;  %249 = vst.msk [vmem:[#allocation9 + $0x4] sm:$0xf] %vm162_vm1, %v309_v21 }
 0x11a   :  { %426 = shalt.err (!%p423_p0)
}
 0x11b   :  { %s427_s7 = scalar_lea.hbm %s599_s3, 256 }
 0x11c   :  { %p428_p1 = scmp.ne.s32.totalorder %s599_s3, %s427_s7  ;;  %p431_p2 = scmp.lt.u32.totalorder %s427_s7, %s599_s3 }
 0x11e   :  { %p433_p3 = pnand %p431_p2, %p428_p1 }
 0x120   :  { %436 = shalt.err (!%p433_p3)
}
 0x121   :  { %263 = dma.vmem_to_hbm [thread:$0]  %s258_s25, 256, %s599_s3, [#allocation4], %s469_s27, %s469_s27, %s470_s28  }
 0x122   :  { %s437_s13 = scalar_lea.vmem %s556_s29, 256  ;;  %p442_p5 = scmp.lt.s32.totalorder %s556_s29, %s556_s29 }
 0x123   :  { %p438_p4 = scmp.ne.s32.totalorder %s556_s29, %s437_s13  ;;  %p443_p6 = scmp.lt.s32.totalorder %s437_s13, %s437_s13 }
 0x125   :  { %p444_p7 = por %p443_p6, %p442_p5 }
 0x127   :  { %p445_p8 = pnand %p444_p7, %p438_p4 }
 0x129   :  { %448 = shalt.err (!%p445_p8)
}
 0x12a   :  { %s449_s16 = scalar_lea.hbm %s600_s4, 256 }
 0x12b   :  { %p450_p9 = scmp.ne.s32.totalorder %s600_s4, %s449_s16  ;;  %p453_p10 = scmp.lt.u32.totalorder %s449_s16, %s600_s4 }
 0x12d   :  { %p455_p11 = pnand %p453_p10, %p450_p9 }
 0x12f   :  { %458 = shalt.err (!%p455_p11)
}
 0x130   :  { %275 = dma.vmem_to_hbm [thread:$0]  %s556_s29, 256, %s600_s4, [#allocation10], %s469_s27, %s469_s27, %s470_s28  }
 0x131   :  { %463 = dma.done.wait [#allocation4], 256  }
 0x132   :  { %464 = vsyncadd [#allocation4], 4294967040 }
 0x133   :  { %465 = dma.done.wait [#allocation10], 256  }
 0x134   :  { %466 = vsyncadd [#allocation10], 4294967040 }
 0x135   :  { %282 = vsyncpa [#allocation3], 1 }
 0x136   :  { %283 = vsyncpa [#allocation6], 1 }
 0x137   :  { %284 = vsyncpa [#allocation4], 1 }
 0x138   :  { %285 = vsyncpa [#allocation10], 1 }

</bundles_post_ra>
